<compile_context>
chip_gen: v5e
topology: v5e:2x2
jax: 0.10.0
libtpu: 0.0.40
codegen_flags: <defaults>
</compile_context>

<pallas_src>
import functools

import jax
import jax.numpy as jnp
from jax.experimental import pallas as pl
from jax.experimental.pallas import tpu as pltpu


def _round_up(n, m):
    return (n + m - 1) // m * m


def _cdiv(a, b):
    return (a + b - 1) // b


def _sublane_multiple(dtype):
    # f32 -> 8, bf16 -> 16, int8/fp8 -> 32 (packed sublane tiling).
    itemsize = jnp.dtype(dtype).itemsize
    return max(8, 32 // itemsize)


# ---------------------------------------------------------------------------
# Streaming pass 1: per-(b, c) spatial mean over the flattened (B*C, HW) view.
# Grid: (n_rows [parallel], n_hw [arbitrary/reduction, last]).
# ---------------------------------------------------------------------------
def _pool_kernel(x_ref, sum_ref, *, inv_hw, hw, t_hw, needs_mask):
    h = pl.program_id(1)

    @pl.when(h == 0)
    def _():
        sum_ref[...] = jnp.zeros_like(sum_ref)

    x = x_ref[...].astype(jnp.float32)
    if needs_mask:
        # Ragged last spatial tile: OOB input reads are unspecified, so zero
        # the lanes beyond HW before summing.
        lane = jax.lax.broadcasted_iota(jnp.int32, x.shape, 1)
        x = jnp.where(lane < (hw - h * t_hw), x, 0.0)
    sum_ref[...] += jnp.sum(x, axis=-1, keepdims=True)

    @pl.when(h == pl.num_programs(1) - 1)
    def _():
        sum_ref[...] = sum_ref[...] * inv_hw


# ---------------------------------------------------------------------------
# Streaming pass 2: out[r, s] = x[r, s] * y[r].  Pure VPU broadcast multiply.
# Grid: (n_rows, n_hw), both parallel.  OOB output stores are discarded, so
# no masking is needed for ragged tiles.
# ---------------------------------------------------------------------------
def _scale_kernel(x_ref, y_ref, o_ref):
    o_ref[...] = x_ref[...] * y_ref[...]


# ---------------------------------------------------------------------------
# Fused single-pass variant for small feature maps: pool + MLP + scale with
# the whole (B, C, HW) tensor resident in VMEM (one read + one write of x).
# ---------------------------------------------------------------------------
def _fused_ca_kernel(x_ref, w1_ref, b1_ref, w2_ref, b2_ref, o_ref, *, inv_hw):
    x = x_ref[...]
    pooled = jnp.sum(x.astype(jnp.float32), axis=-1) * inv_hw          # (B, C)
    h = jax.lax.dot_general(pooled, w1_ref[...],
                            (((1,), (1,)), ((), ())),
                            preferred_element_type=jnp.float32)
    h = jnp.maximum(h + b1_ref[...], 0.0)                               # (B, Cr)
    y = jax.lax.dot_general(h, w2_ref[...],
                            (((1,), (1,)), ((), ())),
                            preferred_element_type=jnp.float32)
    y = jax.nn.sigmoid(y + b2_ref[...])                                 # (B, C)
    o_ref[...] = (x * y[:, :, None].astype(x.dtype)).astype(o_ref.dtype)


def ca_layer(x, w1, b1, w2, b2, *, block_rows=256, block_hw=4096,
             vmem_limit_bytes=48 * 1024 * 1024,
             fuse_bytes_limit=8 * 1024 * 1024,
             fuse=None,
             alias_scale_output=False):
    """CA_Layer forward.

    x : (B, C, H, W)
    w1: (Cr, C), b1: (Cr,)  -- Conv2d(C, C//r, 1) weight/bias (1x1 conv == FC)
    w2: (C, Cr), b2: (C,)   -- Conv2d(C//r, C, 1) weight/bias
    """
    B, C, H, W = x.shape
    Cr = w1.shape[0]
    HW = H * W
    BC = B * C

    if fuse is None:
        # f32 working-set heuristic: fused path only when x comfortably fits
        # in VMEM on every generation (v7x has 64 MiB physical).
        fuse = (x.size * 4) <= fuse_bytes_limit

    # ---------------- fused single-pass path (small feature maps) ----------
    if fuse:
        x3 = x.reshape(B, C, HW)
        out3 = pl.pallas_call(
            functools.partial(_fused_ca_kernel, inv_hw=1.0 / float(HW)),
            out_shape=jax.ShapeDtypeStruct((B, C, HW), x.dtype),
            grid=(1,),
            in_specs=[
                pl.BlockSpec((B, C, HW), lambda i: (0, 0, 0)),
                pl.BlockSpec((Cr, C), lambda i: (0, 0)),
                pl.BlockSpec((1, Cr), lambda i: (0, 0)),
                pl.BlockSpec((C, Cr), lambda i: (0, 0)),
                pl.BlockSpec((1, C), lambda i: (0, 0)),
            ],
            out_specs=pl.BlockSpec((B, C, HW), lambda i: (0, 0, 0)),
            compiler_params=pltpu.CompilerParams(
                vmem_limit_bytes=vmem_limit_bytes),
        )(x3,
          w1.astype(jnp.float32),
          b1.reshape(1, Cr).astype(jnp.float32),
          w2.astype(jnp.float32),
          b2.reshape(1, C).astype(jnp.float32))
        return out3.reshape(B, C, H, W)

    # ---------------- streaming two-pass path -------------------------------
    sub = _sublane_multiple(x.dtype)
    x2 = x.reshape(BC, HW)           # free reshape (row-major view)

    t_hw = min(_round_up(block_hw, 128), _round_up(HW, 128))
    rows_block = min(_round_up(block_rows, sub), _round_up(BC, sub))
    n_hw = _cdiv(HW, t_hw)
    n_rows = _cdiv(BC, rows_block)
    needs_mask = (HW % t_hw) != 0

    # pass 1: pooled spatial mean -> (B*C, 1) f32
    pooled = pl.pallas_call(
        functools.partial(_pool_kernel, inv_hw=1.0 / float(HW), hw=HW,
                          t_hw=t_hw, needs_mask=needs_mask),
        out_shape=jax.ShapeDtypeStruct((BC, 1), jnp.float32),
        grid_spec=pltpu.PrefetchScalarGridSpec(
            num_scalar_prefetch=0,
            grid=(n_rows, n_hw),
            in_specs=[pl.BlockSpec((rows_block, t_hw), lambda r, h: (r, h))],
            out_specs=pl.BlockSpec((rows_block, 1), lambda r, h: (r, 0)),
        ),
        compiler_params=pltpu.CompilerParams(
            dimension_semantics=("parallel", "arbitrary"),
            vmem_limit_bytes=vmem_limit_bytes),
    )(x2)

    # squeeze-excite MLP (microscopic) in plain XLA, kept off the kernel path
    pooled_bc = pooled.reshape(B, C)
    hmid = jnp.maximum(
        pooled_bc @ w1.astype(jnp.float32).T + b1.astype(jnp.float32), 0.0)
    y = jax.nn.sigmoid(
        hmid @ w2.astype(jnp.float32).T + b2.astype(jnp.float32))
    y2 = y.astype(x.dtype).reshape(BC, 1)

    # pass 2: broadcast channel scale (lane-dense output blocks)
    out2 = pl.pallas_call(
        _scale_kernel,
        out_shape=jax.ShapeDtypeStruct((BC, HW), x.dtype),
        grid_spec=pltpu.PrefetchScalarGridSpec(
            num_scalar_prefetch=0,
            grid=(n_rows, n_hw),
            in_specs=[
                pl.BlockSpec((rows_block, t_hw), lambda r, h: (r, h)),
                pl.BlockSpec((rows_block, 1), lambda r, h: (r, 0)),
            ],
            out_specs=pl.BlockSpec((rows_block, t_hw), lambda r, h: (r, h)),
        ),
        # Optional: reuse x's buffer for the output (valid when x is not
        # consumed downstream in the surrounding graph).
        input_output_aliases=({0: 0} if alias_scale_output else {}),
        compiler_params=pltpu.CompilerParams(
            dimension_semantics=("parallel", "parallel"),
            vmem_limit_bytes=vmem_limit_bytes),
    )(x2, y2)

    return out2.reshape(B, C, H, W)


def ca_layer_ref(x, w1, b1, w2, b2):
    """Pure-JAX reference matching the PyTorch CA_Layer forward."""
    pooled = jnp.mean(x.astype(jnp.float32), axis=(2, 3))   # AdaptiveAvgPool2d(1)
    h = jnp.maximum(pooled @ w1.astype(jnp.float32).T + b1, 0.0)
    y = jax.nn.sigmoid(h @ w2.astype(jnp.float32).T + b2)
    return x * y.astype(x.dtype)[:, :, None, None]


if __name__ == "__main__":
    def make_case(key, B, C, H, W, reduction):
        Cr = max(C // reduction, 1)
        kx, k1, k2, k3, k4 = jax.random.split(key, 5)
        x = jax.random.normal(kx, (B, C, H, W), dtype=jnp.float32)
        w1 = 0.1 * jax.random.normal(k1, (Cr, C), dtype=jnp.float32)
        b1 = 0.1 * jax.random.normal(k2, (Cr,), dtype=jnp.float32)
        w2 = 0.1 * jax.random.normal(k3, (C, Cr), dtype=jnp.float32)
        b2 = 0.1 * jax.random.normal(k4, (C,), dtype=jnp.float32)
        return x, w1, b1, w2, b2

    key = jax.random.PRNGKey(0)
    k0, k1 = jax.random.split(key)

    cases = [
        # channel=8, reduction=4, aligned spatial (fused-path eligible)
        make_case(k0, 2, 8, 16, 16, 4),
        # ragged HW (169) and ragged rows (B*C=12): exercises masked tiles
        make_case(k1, 1, 12, 13, 13, 4),
    ]

    for args in cases:
        x = args[0]
        ref = ca_layer_ref(*args)
        out_fused = jax.block_until_ready(ca_layer(*args, fuse=True))
        out_stream = jax.block_until_ready(ca_layer(*args, fuse=False))
        assert out_fused.shape == x.shape
        assert out_stream.shape == x.shape
        assert jnp.allclose(out_fused, ref, atol=1e-4, rtol=1e-4), \
            "fused path mismatch vs reference"
        assert jnp.allclose(out_stream, ref, atol=1e-4, rtol=1e-4), \
            "streaming path mismatch vs reference"

    print("KERNEL_OK")
</pallas_src>

<mosaic_0001>
module attributes {stable_mosaic.version = 11 : i64} {
  func.func @_fused_ca_kernel(%arg0: i32, %arg1: memref<2x8x256xf32, #tpu.memory_space<vmem>>, %arg2: memref<2x8xf32, #tpu.memory_space<vmem>>, %arg3: memref<1x2xf32, #tpu.memory_space<vmem>>, %arg4: memref<8x2xf32, #tpu.memory_space<vmem>>, %arg5: memref<1x8xf32, #tpu.memory_space<vmem>>, %arg6: memref<2x8x256xf32, #tpu.memory_space<vmem>>) attributes {dimension_semantics = [#tpu.dimension_semantics<arbitrary>], iteration_bounds = array<i64: 1>, scalar_prefetch = 0 : i64, scratch_operands = 0 : i64, tpu.core_type = #tpu.core_type<tc>, window_params = [{pipeline_mode = #tpu.pipeline_mode<synchronous>, transform_indices = @transform_0, window_bounds = array<i64: 2, 8, 256>}, {pipeline_mode = #tpu.pipeline_mode<synchronous>, transform_indices = @transform_1, window_bounds = array<i64: 2, 8>}, {pipeline_mode = #tpu.pipeline_mode<synchronous>, transform_indices = @transform_2, window_bounds = array<i64: 1, 2>}, {pipeline_mode = #tpu.pipeline_mode<synchronous>, transform_indices = @transform_3, window_bounds = array<i64: 8, 2>}, {pipeline_mode = #tpu.pipeline_mode<synchronous>, transform_indices = @transform_4, window_bounds = array<i64: 1, 8>}, {pipeline_mode = #tpu.pipeline_mode<synchronous>, transform_indices = @transform_5, window_bounds = array<i64: 2, 8, 256>}]} {
    %c0 = arith.constant 0 : index
    %c0_0 = arith.constant 0 : index
    %c0_1 = arith.constant 0 : index
    %0 = vector.load %arg1[%c0, %c0_0, %c0_1] : memref<2x8x256xf32, #tpu.memory_space<vmem>>, vector<2x8x256xf32>
    %cst = arith.constant dense<0.000000e+00> : vector<2x8xf32>
    %1 = vector.multi_reduction <add>, %0, %cst [2] : vector<2x8x256xf32> to vector<2x8xf32>
    %cst_2 = arith.constant 3.906250e-03 : f32
    %2 = vector.broadcast %cst_2 : f32 to vector<2x8xf32>
    %3 = arith.mulf %1, %2 : vector<2x8xf32>
    %c0_3 = arith.constant 0 : index
    %c0_4 = arith.constant 0 : index
    %4 = vector.load %arg2[%c0_3, %c0_4] : memref<2x8xf32, #tpu.memory_space<vmem>>, vector<2x8xf32>
    %cst_5 = arith.constant dense<0.000000e+00> : vector<2x2xf32>
    %5 = tpu.matmul %3, %4, %cst_5 {dimension_numbers = #tpu.dot_dimension_numbers<[1], [1], [0], [0], [0, 0, 1, 0], [], []>} : vector<2x8xf32>, vector<2x8xf32>, vector<2x2xf32> -> vector<2x2xf32>
    %c0_6 = arith.constant 0 : index
    %c0_7 = arith.constant 0 : index
    %6 = vector.load %arg3[%c0_6, %c0_7] : memref<1x2xf32, #tpu.memory_space<vmem>>, vector<1x2xf32>
    %7 = vector.broadcast %6 : vector<1x2xf32> to vector<2x2xf32>
    %8 = arith.addf %5, %7 : vector<2x2xf32>
    %cst_8 = arith.constant 0.000000e+00 : f32
    %9 = vector.broadcast %cst_8 : f32 to vector<2x2xf32>
    %10 = arith.maximumf %8, %9 : vector<2x2xf32>
    %c0_9 = arith.constant 0 : index
    %c0_10 = arith.constant 0 : index
    %11 = vector.load %arg4[%c0_9, %c0_10] : memref<8x2xf32, #tpu.memory_space<vmem>>, vector<8x2xf32>
    %cst_11 = arith.constant dense<0.000000e+00> : vector<2x8xf32>
    %12 = tpu.matmul %10, %11, %cst_11 {dimension_numbers = #tpu.dot_dimension_numbers<[1], [1], [0], [0], [0, 0, 1, 0], [], []>} : vector<2x2xf32>, vector<8x2xf32>, vector<2x8xf32> -> vector<2x8xf32>
    %c0_12 = arith.constant 0 : index
    %c0_13 = arith.constant 0 : index
    %13 = vector.load %arg5[%c0_12, %c0_13] : memref<1x8xf32, #tpu.memory_space<vmem>>, vector<1x8xf32>
    %14 = vector.broadcast %13 : vector<1x8xf32> to vector<2x8xf32>
    %15 = arith.addf %12, %14 : vector<2x8xf32>
    %16 = arith.negf %15 : vector<2x8xf32>
    %17 = math.exp %16 : vector<2x8xf32>
    %cst_14 = arith.constant 1.000000e+00 : f32
    %18 = vector.broadcast %cst_14 : f32 to vector<2x8xf32>
    %19 = arith.addf %18, %17 : vector<2x8xf32>
    %20 = arith.divf %18, %19 : vector<2x8xf32>
    %21 = vector.shape_cast %20 : vector<2x8xf32> to vector<2x8x1xf32>
    %22 = vector.broadcast %21 : vector<2x8x1xf32> to vector<2x8x256xf32>
    %23 = arith.mulf %0, %22 : vector<2x8x256xf32>
    %c0_15 = arith.constant 0 : index
    %c0_16 = arith.constant 0 : index
    %c0_17 = arith.constant 0 : index
    %24 = vector.load %arg6[%c0_15, %c0_16, %c0_17] : memref<2x8x256xf32, #tpu.memory_space<vmem>>, vector<2x8x256xf32>
    tpu.vector_store %arg6[%c0_15, %c0_16, %c0_17], %23 {strides = array<i32>} : memref<2x8x256xf32, #tpu.memory_space<vmem>>, vector<2x8x256xf32>,
    return
  }
  func.func @transform_0(%arg0: i32) -> (i32, i32, i32) {
    %c0_i32 = arith.constant 0 : i32
    %c0_i32_0 = arith.constant 0 : i32
    %c0_i32_1 = arith.constant 0 : i32
    %c0_i32_2 = arith.constant 0 : i32
    return %c0_i32, %c0_i32_0, %c0_i32_1 : i32, i32, i32
  }
  func.func @transform_1(%arg0: i32) -> (i32, i32) {
    %c0_i32 = arith.constant 0 : i32
    %c0_i32_0 = arith.constant 0 : i32
    %c0_i32_1 = arith.constant 0 : i32
    return %c0_i32, %c0_i32_0 : i32, i32
  }
  func.func @transform_2(%arg0: i32) -> (i32, i32) {
    %c0_i32 = arith.constant 0 : i32
    %c0_i32_0 = arith.constant 0 : i32
    %c0_i32_1 = arith.constant 0 : i32
    return %c0_i32, %c0_i32_0 : i32, i32
  }
  func.func @transform_3(%arg0: i32) -> (i32, i32) {
    %c0_i32 = arith.constant 0 : i32
    %c0_i32_0 = arith.constant 0 : i32
    %c0_i32_1 = arith.constant 0 : i32
    return %c0_i32, %c0_i32_0 : i32, i32
  }
  func.func @transform_4(%arg0: i32) -> (i32, i32) {
    %c0_i32 = arith.constant 0 : i32
    %c0_i32_0 = arith.constant 0 : i32
    %c0_i32_1 = arith.constant 0 : i32
    return %c0_i32, %c0_i32_0 : i32, i32
  }
  func.func @transform_5(%arg0: i32) -> (i32, i32, i32) {
    %c0_i32 = arith.constant 0 : i32
    %c0_i32_0 = arith.constant 0 : i32
    %c0_i32_1 = arith.constant 0 : i32
    %c0_i32_2 = arith.constant 0 : i32
    return %c0_i32, %c0_i32_0, %c0_i32_1 : i32, i32, i32
  }
}

</mosaic_0001>

<bundles_post_ra>
// kernel: tpu_custom_call.1
= control target key start
LH: loop header
LB: loop body
LE: loop exit
PB: predicated region body
PF: predicated region fallthrough
CT: control target
= control target key end

     0   :  { %10 = vsyncpa [#allocation3], 0  ;;  %s316_s0 = inlined_call_operand.hbm [shape: f32[2,8,256], index: 0, kind: input, shape index: {}]   ;;  %s317_s1 = inlined_call_operand.vmem [shape: f32[2,8], index: 1, kind: input, shape index: {}]   ;;  %s318_s2 = inlined_call_operand.vmem [shape: f32[1,2], index: 2, kind: input, shape index: {}]   ;;  %s319_s3 = inlined_call_operand.vmem [shape: f32[8,2], index: 3, kind: input, shape index: {}]   ;;  %s320_s4 = inlined_call_operand.vmem [shape: f32[1,8], index: 4, kind: input, shape index: {}]   ;;  %s321_s5 = inlined_call_operand.hbm [shape: f32[2,8,256], index: 5, kind: output, shape index: {}]  }
   0x1   :  { %11 = vsyncpa [#allocation4], 0  ;;  %s16_s20 = sshll.u32 %s316_s0, 4  ;;  %s250_s21 = smov [#allocation2]   ;;  %s17_s20 = int_to_ptr.hbm [resolvable:$true] %s16_s20 }
   0x2   :  { %s18_s22 = sshll.u32 %s250_s21, 4  ;;  %s251_s23 = smov 256   ;;  %s19_s22 = int_to_ptr.vmem [resolvable:$true] %s18_s22 }
   0x3   :  { %s252_s24 = smov 16  }
   0x4   :  { %24 = dma.hbm_to_vmem [thread:$0]  %s17_s20, 512, %s19_s22, [#allocation3], %s251_s23, %s251_s23, %s252_s24  }
   0x5   :  { %246 = dma.done.wait [#allocation3], 512  }
   0x6   :  { %247 = vsyncadd [#allocation3], 4294966784  ;;  %v37_v0 = vld [vmem:[#allocation2] sm:$0xff]  ;;  %v38_v1 = vld [vmem:[#allocation2 + $0x8] sm:$0xff]  ;;  %vm62_vm0 = vcmask 64512   ;;  %v56_v8 = vlaneseq  ;;  %vm60_vm1 = vcmask 1041409  }
   0x7   :  { %v41_v2 = vadd.f32 %v38_v1, %v37_v0  ;;  %v290_v3 = vld [vmem:[#allocation2 + $0x10] sm:$0xff]  ;;  %v292_v4 = vld [vmem:[#allocation2 + $0x18] sm:$0xff]  ;;  %v49_v6 = vld [vmem:[%s317_s1] sm:$0x3]  ;;  %vm94_vm2 = vcmask 15360   ;;  %s168_s7 = sshll.u32 %s321_s5, 4  ;;  %s169_s7 = int_to_ptr.hbm [resolvable:$true] %s168_s7 }
   0x8   :  { %v44_v5 = vadd.f32 %v292_v4, %v290_v3  ;;  %181 = vmatpush.xpose.msk.msra.mxu0 %vm62_vm0, %v49_v6  ;;  %v57_v9 = vand.u32 127, %v56_v8  ;;  %v89_v16 = vld [vmem:[%s319_s3] sm:$0xff]  ;;  %v142_v21 = vshrl.u32 %v56_v8, 7 }
   0x9   :  { %42 = vadd.xlane.f32.xlu0 %v41_v2  ;;  %183 = vmatpush.xpose.msk.msra.mxu1 %vm94_vm2, %v89_v16  ;;  %v192_v17 = vld [vmem:[%s318_s2] ss:$0 sm:$0xff]  ;;  %s253_s2 = smov [#allocation5]  }
   0xa   :  { %190 = vset.pattern.permute.xlu1 %v142_v21  ;;  %191 = vset.pattern.permute.xlu0 %v142_v21  ;;  %v193_v22 = vld [vmem:[%s320_s4] ss:$0 sm:$0xff]  ;;  %s166_s3 = sshll.u32 %s253_s2, 4  ;;  %s167_s3 = int_to_ptr.vmem [resolvable:$true] %s166_s3 }
  0x11   :  { %45 = vadd.xlane.f32.xlu0 %v44_v5 }
  0x7c   :  { %v43_v7 = vpop.xlane.xlu0 %42 }
  0x7d   :  { %v47_v10 = vmul.f32 0.00390625, %v43_v7 }
  0x7f   :  { %v58_v13 = vperm.slane %v47_v10, %v57_v9 }
  0x84   :  { %v46_v11 = vpop.xlane.xlu0 %45 }
  0x85   :  { %v48_v12 = vmul.f32 0.00390625, %v46_v11 }
  0x87   :  { %v59_v14 = vperm.slane %v48_v12, %v57_v9 }
  0x89   :  { %v61_v15 = vsel %vm60_vm1, %v59_v14, %v58_v13 }
  0x8a   :  { %182 = vmatmul.msk.f32.vlgmr.msra.gmra.mxu0 %vm62_vm0, %v61_v15 }
 0x107   :  { %v85_v18 = vpop.f32.mrf.mxu0 }
 0x108   :  { %v86_v19 = vadd.f32 %v192_v17, %v85_v18 }
 0x10a   :  { %v88_v20 = vmax.f32 %v86_v19, 0.0 }
 0x10c   :  { %184 = vmatmul.msk.f32.vlgmr.msra.gmra.mxu1 %vm94_vm2, %v88_v20 }
 0x189   :  { %v118_v23 = vpop.f32.mrf.mxu1 }
 0x18a   :  { %v119_v24 = vadd.f32 %v193_v22, %v118_v23 }
 0x18c   :  { %v185_v25 = vmul.f32 -1.442695, %v119_v24 }
 0x18e   :  { %194 = vpow2.f32 %v185_v25 }
 0x194   :  { %v195_v26 = vpop.eup %194 }
 0x195   :  { %v124_v27 = vadd.f32 1.0, %v195_v26 }
 0x197   :  { %196 = vrcp.f32 %v124_v27  ;;  %v136_v31 = vand.u32 2147483648, %v124_v27  ;;  %v134_v33 = vand.u32 2147483647, %v124_v27  ;;  %vm130_vm4 = vweird.f32 %v124_v27 }
 0x199   :  { %v137_v35 = vor.u32 1.1754944e-38, %v136_v31  ;;  %vm135_vm6 = vcmp.eq.f32.partialorder %v134_v33, 8.507059e+37 }
 0x19d   :  { %v197_v28 = vpop.eup %196 }
 0x19e   :  { %v126_v29 = vmul.f32 %v197_v28, %v124_v27  ;;  %vm131_vm3 = vweird.f32 %v197_v28 }
 0x19f   :  { %vm132_vm5 = vmor %vm130_vm4, %vm131_vm3 }
 0x1a0   :  { %v127_v30 = vsub.f32 1.0, %v126_v29 }
 0x1a2   :  { %v128_v32 = vmul.f32 %v197_v28, %v127_v30 }
 0x1a4   :  { %v129_v34 = vadd.f32 %v197_v28, %v128_v32 }
 0x1a6   :  { %v133_v36 = vsel %vm132_vm5, %v197_v28, %v129_v34 }
 0x1a7   :  { %v138_v37 = vsel %vm135_vm6, %v137_v35, %v133_v36 }
 0x1a8   :  { %v140_v38 = vperm.slane %v138_v37, 0  ;;  %v147_v39 = vperm.slane %v138_v37, 1 }
 0x1aa   :  { %145 = vperm.xlu1 %190, %v140_v38  }
 0x1b2   :  { %152 = vperm.xlu1 %190, %v147_v39  }
 0x21c   :  { %v146_v40 = vpop.permute.xlu1 %145 }
 0x21d   :  { %v154_v41 = vmul.f32 %v146_v40, %v37_v0  ;;  %v155_v42 = vmul.f32 %v146_v40, %v38_v1 }
 0x21f   :  { %158 = vst [vmem:[#allocation5] sm:$0xff] %v154_v41 }
 0x220   :  { %159 = vst [vmem:[#allocation5 + $0x8] sm:$0xff] %v155_v42 }
 0x224   :  { %v153_v43 = vpop.permute.xlu1 %152 }
 0x225   :  { %v156_v44 = vmul.f32 %v153_v43, %v290_v3  ;;  %v157_v45 = vmul.f32 %v153_v43, %v292_v4 }
 0x227   :  { %160 = vst [vmem:[#allocation5 + $0x10] sm:$0xff] %v156_v44 }
 0x228   :  { %161 = vst [vmem:[#allocation5 + $0x18] sm:$0xff] %v157_v45 }
 0x229   :  { %174 = dma.vmem_to_hbm [thread:$0]  %s167_s3, 512, %s169_s7, [#allocation4], %s251_s23, %s251_s23, %s252_s24  }
 0x22a   :  { %248 = dma.done.wait [#allocation4], 512  }
 0x22b   :  { %249 = vsyncadd [#allocation4], 4294966784 }
 0x22c   :  { %179 = vsyncpa [#allocation3], 1 }
 0x22d   :  { %180 = vsyncpa [#allocation4], 1 }

</bundles_post_ra>
